<compile_context>
chip_gen: v7x
topology: tpu7x:2x2x1
jax: 0.10.0
libtpu: 0.0.40
codegen_flags: <defaults>
</compile_context>

<pallas_src>
import functools
import math

import numpy as np
import jax
import jax.numpy as jnp
from jax import lax
from jax.experimental import pallas as pl
from jax.experimental.pallas import tpu as pltpu

NUM_ANGLE_BIN = 8


# ----------------------------------------------------------------------------
# Host-side line graph construction (integer bookkeeping, dynamic shapes).
# TODO(synk): argsort/bincount/repeat_interleave with data-dependent output sizes have no
# clean Pallas equivalent; kept in numpy glue.
# ----------------------------------------------------------------------------
def construct_line_graph_indices(edge_list, num_node):
    edge_list = np.asarray(edge_list)
    node_in, node_out = edge_list[:, 0], edge_list[:, 1]
    num_edge = edge_list.shape[0]
    edge_index = np.arange(num_edge)
    edge_in = edge_index[np.argsort(node_out, kind="stable")]
    edge_out = edge_index[np.argsort(node_in, kind="stable")]
    degree_in = np.bincount(node_in, minlength=num_node)
    degree_out = np.bincount(node_out, minlength=num_node)
    size = degree_out * degree_in
    starts = np.repeat(np.cumsum(size) - size, size)
    rng = np.arange(int(size.sum()))
    local_index = rng - starts
    local_inner_size = np.repeat(degree_in, size)
    edge_in_offset = np.repeat(np.cumsum(degree_out) - degree_out, size)
    edge_out_offset = np.repeat(np.cumsum(degree_in) - degree_in, size)
    edge_in_index = local_index // local_inner_size + edge_in_offset
    edge_out_index = local_index % local_inner_size + edge_out_offset
    line_edge_list = np.stack([edge_in[edge_in_index], edge_out[edge_out_index]], axis=-1)
    return line_edge_list, size


# ----------------------------------------------------------------------------
# Pallas kernel: per-edge-pair dot / cross / norm / angle-binning.
#   v_ref  : (6, TR, 128) f32  — components [v1x, v1y, v1z, v2x, v2y, v2z], lane-dense tiles
#   rel_ref: (TR, 128) int32
# ----------------------------------------------------------------------------
def angle_bin_kernel(v_ref, rel_ref, *, num_angle_bin):
    a0, a1, a2 = v_ref[0], v_ref[1], v_ref[2]        # v1 components, (TR, 128) each
    b0, b1, b2 = v_ref[3], v_ref[4], v_ref[5]        # v2 components

    # dot(v1, v2)
    x = a0 * b0 + a1 * b1 + a2 * b2                  # (TR, 128)

    # ||cross(v1, v2)||^2
    cx = a1 * b2 - a2 * b1
    cy = a2 * b0 - a0 * b2
    cz = a0 * b1 - a1 * b0
    y2 = cx * cx + cy * cy + cz * cz

    r2 = x * x + y2                                  # |v1|^2 |v2|^2
    c = x * lax.rsqrt(r2)                            # cos(theta); NaN when r2 == 0 (EUP slot)

    # relation = floor(atan2(y, x)/pi * nb) = #{k in [1..nb] : cos(theta) <= cos(k*pi/nb)}
    rel = jnp.zeros_like(x, dtype=jnp.int32)
    for k in range(1, num_angle_bin + 1):
        thr = math.cos(math.pi * k / num_angle_bin)
        rel = rel + (c <= thr).astype(jnp.int32)     # NaN -> False -> bin 0
    rel = jnp.where(r2 > 0.0, rel, 0)                # explicit guard: atan2(0,0) == 0 -> bin 0

    rel_ref[...] = rel                               # full-vreg, unmasked stores


def _choose_tile(num_edges):
    """Rows of 128 lanes per grid step.  Max 1024 rows (~3 MiB in + 0.5 MiB out per step,
    ~7 MiB double-buffered -> fits v5e's 16 MiB default scoped VMEM).  If everything fits
    in a single block, split into 2 steps so v7x's two TensorCores both get work."""
    rows = pl.cdiv(max(num_edges, 1), 128)
    rows = pl.cdiv(rows, 8) * 8                      # sublane-align block row count
    max_tr = 1024
    if rows > max_tr:
        tr = max_tr
    elif rows >= 16:
        tr = pl.cdiv(pl.cdiv(rows, 2), 8) * 8        # exactly 2 grid steps
    else:
        tr = rows
    rows_pad = pl.cdiv(rows, tr) * tr
    return tr, rows_pad


@functools.partial(jax.jit, static_argnames=("num_angle_bin",))
def compute_relation(pos, node_i, node_j, node_k, *, num_angle_bin=NUM_ANGLE_BIN):
    """pos: (N, 3) float32; node_*: (E,) int32 indices. Returns (E,) int32 relation ids."""
    e = node_i.shape[0]
    tr, rows_pad = _choose_tile(e)
    e_pad = rows_pad * 128
    n_blocks = rows_pad // tr

    # Fused gather + subtract directly in (3, E) layout (no (E,3)->(3,E) transpose pass);
    # single pad + reshape builds the component-major (6, rows_pad, 128) slab.
    pos_t = jnp.asarray(pos, jnp.float32).T                        # (3, N)
    v1 = pos_t[:, node_i] - pos_t[:, node_j]                       # (3, E)
    v2 = pos_t[:, node_k] - pos_t[:, node_j]                       # (3, E)
    packed = jnp.pad(jnp.concatenate([v1, v2], axis=0),            # (6, E)
                     ((0, 0), (0, e_pad - e)))                     # (6, e_pad)
    packed = packed.reshape(6, rows_pad, 128)                      # component-major, lane-dense

    kern = functools.partial(angle_bin_kernel, num_angle_bin=num_angle_bin)
    rel = pl.pallas_call(
        kern,
        out_shape=jax.ShapeDtypeStruct((rows_pad, 128), jnp.int32),
        grid_spec=pltpu.PrefetchScalarGridSpec(
            num_scalar_prefetch=0,
            grid=(n_blocks,),
            in_specs=[pl.BlockSpec((6, tr, 128), lambda i: (0, i, 0))],
            out_specs=pl.BlockSpec((tr, 128), lambda i: (i, 0)),
        ),
        compiler_params=pltpu.CompilerParams(dimension_semantics=("parallel",)),
    )(packed)
    return rel.reshape(-1)[:e]


# ----------------------------------------------------------------------------
# SpatialLineGraph.forward
# ----------------------------------------------------------------------------
def spatial_line_graph_forward(graph, num_angle_bin=NUM_ANGLE_BIN):
    edge_list = np.asarray(graph["edge_list"])
    line_edge_list, size = construct_line_graph_indices(edge_list, graph["num_node"])

    node_in, node_out = edge_list[:, 0], edge_list[:, 1]
    edge_in, edge_out = line_edge_list[:, 0], line_edge_list[:, 1]
    node_i = np.asarray(node_out[edge_out], np.int32)
    node_j = np.asarray(node_in[edge_out], np.int32)
    node_k = np.asarray(node_in[edge_in], np.int32)

    pos = graph["node_position"]                                   # (N, 3) jnp array

    # Pallas kernel (gathers + packing fused under jit with the kernel call).
    relation = compute_relation(pos, node_i, node_j, node_k, num_angle_bin=num_angle_bin)

    out_edge_list = jnp.concatenate(
        [jnp.asarray(line_edge_list, jnp.int32), relation[:, None].astype(jnp.int32)], axis=-1
    )

    # packed-graph bookkeeping of the line graph (mirrors Data(...) fields)
    node2graph = np.asarray(graph["node2graph"])
    num_nodes_lg = np.asarray(graph["num_edges"])                  # line-graph node counts
    num_edges_lg = np.zeros(graph["batch_size"], dtype=np.int64)
    np.add.at(num_edges_lg, node2graph, size)                      # scatter_add(size, node2graph)
    num_cum_nodes_lg = np.cumsum(num_nodes_lg)
    offsets = np.repeat(num_cum_nodes_lg - num_nodes_lg, num_edges_lg)

    return {
        "edge_list": out_edge_list,
        "edge_weight": jnp.ones((line_edge_list.shape[0],), jnp.float32),
        "num_nodes": jnp.asarray(num_nodes_lg, jnp.int32),
        "num_edges": jnp.asarray(num_edges_lg, jnp.int32),
        "offsets": jnp.asarray(offsets, jnp.int32),
        "num_relation": num_angle_bin,
        "node_feature": graph.get("edge_feature", None),
        # index triplet returned for reference checking
        "_geom_idx": (node_i, node_j, node_k),
    }


def relation_reference_frac(pos_i, pos_j, pos_k, num_angle_bin=NUM_ANGLE_BIN):
    v1 = pos_i - pos_j
    v2 = pos_k - pos_j
    x = jnp.sum(v1 * v2, axis=-1)
    y = jnp.linalg.norm(jnp.cross(v1, v2), axis=-1)
    angle = jnp.arctan2(y, x)
    return angle / math.pi * num_angle_bin


if __name__ == "__main__":
    key = jax.random.PRNGKey(0)

    # Small packed graph: 2 graphs, 5 + 4 nodes, 7 + 5 directed edges (global node indices).
    edge_list = np.array(
        [
            [0, 1], [1, 2], [2, 3], [3, 4], [4, 0], [1, 3], [2, 0],   # graph 0
            [5, 6], [6, 7], [7, 8], [8, 5], [6, 8],                   # graph 1
        ],
        dtype=np.int32,
    )
    num_node = 9
    node2graph = np.array([0] * 5 + [1] * 4, dtype=np.int32)
    num_edges = np.array([7, 5], dtype=np.int32)

    k_pos, k_feat = jax.random.split(key)
    node_position = jax.random.normal(k_pos, (num_node, 3), dtype=jnp.float32)
    edge_feature = jax.random.normal(k_feat, (edge_list.shape[0], 16), dtype=jnp.float32)

    graph = {
        "edge_list": edge_list,
        "node_position": node_position,
        "edge_feature": edge_feature,
        "num_node": num_node,
        "num_edges": num_edges,
        "node2graph": node2graph,
        "batch_size": 2,
    }

    out = spatial_line_graph_forward(graph, num_angle_bin=NUM_ANGLE_BIN)
    jax.block_until_ready(out["edge_list"])

    # correctness check against a plain-JAX reference of the geometric hot path
    node_i, node_j, node_k = out["_geom_idx"]
    pos_i = node_position[node_i]
    pos_j = node_position[node_j]
    pos_k = node_position[node_k]
    frac = np.asarray(relation_reference_frac(pos_i, pos_j, pos_k, NUM_ANGLE_BIN))
    ref = frac.astype(np.int32)
    got = np.asarray(out["edge_list"][:, 2])
    assert got.shape == ref.shape, (got.shape, ref.shape)
    # allow +-1 disagreement only for angles numerically on a bin boundary
    near_boundary = np.abs(frac - np.round(frac)) < 1e-4
    ok = (got == ref) | near_boundary
    assert ok.all(), (got, ref)

    print("KERNEL_OK")
</pallas_src>

<mosaic_0001>
module attributes {stable_mosaic.version = 11 : i64} {
  func.func @angle_bin_kernel(%arg0: i32, %arg1: memref<6x8x128xf32, #tpu.memory_space<vmem>>, %arg2: memref<8x128xi32, #tpu.memory_space<vmem>>) attributes {dimension_semantics = [#tpu.dimension_semantics<parallel>], iteration_bounds = array<i64: 1>, scalar_prefetch = 0 : i64, scratch_operands = 0 : i64, tpu.core_type = #tpu.core_type<tc>, window_params = [{transform_indices = @transform_0, window_bounds = array<i64: 6, 8, 128>}, {transform_indices = @transform_1, window_bounds = array<i64: 8, 128>}]} {
    %c0 = arith.constant 0 : index
    %c0_0 = arith.constant 0 : index
    %c0_1 = arith.constant 0 : index
    %0 = vector.load %arg1[%c0, %c0_0, %c0_1] : memref<6x8x128xf32, #tpu.memory_space<vmem>>, vector<1x8x128xf32>
    %1 = vector.shape_cast %0 : vector<1x8x128xf32> to vector<8x128xf32>
    %c1 = arith.constant 1 : index
    %c0_2 = arith.constant 0 : index
    %c0_3 = arith.constant 0 : index
    %2 = vector.load %arg1[%c1, %c0_2, %c0_3] : memref<6x8x128xf32, #tpu.memory_space<vmem>>, vector<1x8x128xf32>
    %3 = vector.shape_cast %2 : vector<1x8x128xf32> to vector<8x128xf32>
    %c2 = arith.constant 2 : index
    %c0_4 = arith.constant 0 : index
    %c0_5 = arith.constant 0 : index
    %4 = vector.load %arg1[%c2, %c0_4, %c0_5] : memref<6x8x128xf32, #tpu.memory_space<vmem>>, vector<1x8x128xf32>
    %5 = vector.shape_cast %4 : vector<1x8x128xf32> to vector<8x128xf32>
    %c3 = arith.constant 3 : index
    %c0_6 = arith.constant 0 : index
    %c0_7 = arith.constant 0 : index
    %6 = vector.load %arg1[%c3, %c0_6, %c0_7] : memref<6x8x128xf32, #tpu.memory_space<vmem>>, vector<1x8x128xf32>
    %7 = vector.shape_cast %6 : vector<1x8x128xf32> to vector<8x128xf32>
    %c4 = arith.constant 4 : index
    %c0_8 = arith.constant 0 : index
    %c0_9 = arith.constant 0 : index
    %8 = vector.load %arg1[%c4, %c0_8, %c0_9] : memref<6x8x128xf32, #tpu.memory_space<vmem>>, vector<1x8x128xf32>
    %9 = vector.shape_cast %8 : vector<1x8x128xf32> to vector<8x128xf32>
    %c5 = arith.constant 5 : index
    %c0_10 = arith.constant 0 : index
    %c0_11 = arith.constant 0 : index
    %10 = vector.load %arg1[%c5, %c0_10, %c0_11] : memref<6x8x128xf32, #tpu.memory_space<vmem>>, vector<1x8x128xf32>
    %11 = vector.shape_cast %10 : vector<1x8x128xf32> to vector<8x128xf32>
    %12 = arith.mulf %1, %7 : vector<8x128xf32>
    %13 = arith.mulf %3, %9 : vector<8x128xf32>
    %14 = arith.addf %12, %13 : vector<8x128xf32>
    %15 = arith.mulf %5, %11 : vector<8x128xf32>
    %16 = arith.addf %14, %15 : vector<8x128xf32>
    %17 = arith.mulf %3, %11 : vector<8x128xf32>
    %18 = arith.mulf %5, %9 : vector<8x128xf32>
    %19 = arith.subf %17, %18 : vector<8x128xf32>
    %20 = arith.mulf %5, %7 : vector<8x128xf32>
    %21 = arith.mulf %1, %11 : vector<8x128xf32>
    %22 = arith.subf %20, %21 : vector<8x128xf32>
    %23 = arith.mulf %1, %9 : vector<8x128xf32>
    %24 = arith.mulf %3, %7 : vector<8x128xf32>
    %25 = arith.subf %23, %24 : vector<8x128xf32>
    %26 = arith.mulf %19, %19 : vector<8x128xf32>
    %27 = arith.mulf %22, %22 : vector<8x128xf32>
    %28 = arith.addf %26, %27 : vector<8x128xf32>
    %29 = arith.mulf %25, %25 : vector<8x128xf32>
    %30 = arith.addf %28, %29 : vector<8x128xf32>
    %31 = arith.mulf %16, %16 : vector<8x128xf32>
    %32 = arith.addf %31, %30 : vector<8x128xf32>
    %33 = math.rsqrt %32 : vector<8x128xf32>
    %34 = arith.mulf %16, %33 : vector<8x128xf32>
    %c0_i32 = arith.constant 0 : i32
    %35 = vector.broadcast %c0_i32 : i32 to vector<8x128xi32>
    %cst = arith.constant 0.923879504 : f32
    %36 = vector.broadcast %cst : f32 to vector<8x128xf32>
    %37 = arith.cmpf ole, %34, %36 : vector<8x128xf32>
    %38 = arith.extui %37 : vector<8x128xi1> to vector<8x128xi32>
    %39 = arith.addi %35, %38 : vector<8x128xi32>
    %cst_12 = arith.constant 0.707106769 : f32
    %40 = vector.broadcast %cst_12 : f32 to vector<8x128xf32>
    %41 = arith.cmpf ole, %34, %40 : vector<8x128xf32>
    %42 = arith.extui %41 : vector<8x128xi1> to vector<8x128xi32>
    %43 = arith.addi %39, %42 : vector<8x128xi32>
    %cst_13 = arith.constant 0.382683426 : f32
    %44 = vector.broadcast %cst_13 : f32 to vector<8x128xf32>
    %45 = arith.cmpf ole, %34, %44 : vector<8x128xf32>
    %46 = arith.extui %45 : vector<8x128xi1> to vector<8x128xi32>
    %47 = arith.addi %43, %46 : vector<8x128xi32>
    %cst_14 = arith.constant 6.12323426E-17 : f32
    %48 = vector.broadcast %cst_14 : f32 to vector<8x128xf32>
    %49 = arith.cmpf ole, %34, %48 : vector<8x128xf32>
    %50 = arith.extui %49 : vector<8x128xi1> to vector<8x128xi32>
    %51 = arith.addi %47, %50 : vector<8x128xi32>
    %cst_15 = arith.constant -0.382683426 : f32
    %52 = vector.broadcast %cst_15 : f32 to vector<8x128xf32>
    %53 = arith.cmpf ole, %34, %52 : vector<8x128xf32>
    %54 = arith.extui %53 : vector<8x128xi1> to vector<8x128xi32>
    %55 = arith.addi %51, %54 : vector<8x128xi32>
    %cst_16 = arith.constant -0.707106769 : f32
    %56 = vector.broadcast %cst_16 : f32 to vector<8x128xf32>
    %57 = arith.cmpf ole, %34, %56 : vector<8x128xf32>
    %58 = arith.extui %57 : vector<8x128xi1> to vector<8x128xi32>
    %59 = arith.addi %55, %58 : vector<8x128xi32>
    %cst_17 = arith.constant -0.923879504 : f32
    %60 = vector.broadcast %cst_17 : f32 to vector<8x128xf32>
    %61 = arith.cmpf ole, %34, %60 : vector<8x128xf32>
    %62 = arith.extui %61 : vector<8x128xi1> to vector<8x128xi32>
    %63 = arith.addi %59, %62 : vector<8x128xi32>
    %cst_18 = arith.constant -1.000000e+00 : f32
    %64 = vector.broadcast %cst_18 : f32 to vector<8x128xf32>
    %65 = arith.cmpf ole, %34, %64 : vector<8x128xf32>
    %66 = arith.extui %65 : vector<8x128xi1> to vector<8x128xi32>
    %67 = arith.addi %63, %66 : vector<8x128xi32>
    %cst_19 = arith.constant 0.000000e+00 : f32
    %68 = vector.broadcast %cst_19 : f32 to vector<8x128xf32>
    %69 = arith.cmpf ogt, %32, %68 : vector<8x128xf32>
    %c0_i32_20 = arith.constant 0 : i32
    %70 = vector.broadcast %c0_i32_20 : i32 to vector<8x128xi32>
    %71 = arith.select %69, %67, %70 : vector<8x128xi1>, vector<8x128xi32>
    %c0_21 = arith.constant 0 : index
    %c0_22 = arith.constant 0 : index
    %72 = vector.load %arg2[%c0_21, %c0_22] : memref<8x128xi32, #tpu.memory_space<vmem>>, vector<8x128xi32>
    tpu.vector_store %arg2[%c0_21, %c0_22], %71 {strides = array<i32>} : memref<8x128xi32, #tpu.memory_space<vmem>>, vector<8x128xi32>,
    return
  }
  func.func @transform_0(%arg0: i32) -> (i32, i32, i32) {
    %c0_i32 = arith.constant 0 : i32
    %c0_i32_0 = arith.constant 0 : i32
    %c0_i32_1 = arith.constant 0 : i32
    return %c0_i32, %arg0, %c0_i32_0 : i32, i32, i32
  }
  func.func @transform_1(%arg0: i32) -> (i32, i32) {
    %c0_i32 = arith.constant 0 : i32
    %c0_i32_0 = arith.constant 0 : i32
    return %arg0, %c0_i32 : i32, i32
  }
}

</mosaic_0001>

<bundles_post_ra>
// kernel: compute_relation.1
= control target key start
LH: loop header
LB: loop body
LE: loop exit
PB: predicated region body
PF: predicated region fallthrough
CT: control target
= control target key end

     0   :  { %v80_v29 = vmov 0   ;;  %s112_s0 = inlined_call_operand.vmem [shape: f32[6,8,128], index: 0, kind: input, shape index: {}]   ;;  %s113_s1 = inlined_call_operand.vmem [shape: s32[8,128], index: 1, kind: output, shape index: {}]  }
   0x1   :  { %v8_v0 = vld [vmem:[%s112_s0] sm:$0xff]  ;;  %v72_v1 = vld [vmem:[%s112_s0 + $0x8] sm:$0xff]  ;;  %v73_v2 = vld [vmem:[%s112_s0 + $0x10] sm:$0xff] }
   0x2   :  { %v74_v3 = vld [vmem:[%s112_s0 + $0x18] sm:$0xff]  ;;  %v75_v4 = vld [vmem:[%s112_s0 + $0x20] sm:$0xff]  ;;  %v76_v5 = vld [vmem:[%s112_s0 + $0x28] sm:$0xff] }
   0x3   :  { %v19_v6 = vmul.f32 %v74_v3, %v8_v0  ;;  %v20_v7 = vmul.f32 %v75_v4, %v72_v1  ;;  %v22_v8 = vmul.f32 %v76_v5, %v73_v2  ;;  %v24_v9 = vmul.f32 %v76_v5, %v72_v1 }
   0x4   :  { %v25_v10 = vmul.f32 %v75_v4, %v73_v2  ;;  %v27_v11 = vmul.f32 %v74_v3, %v73_v2  ;;  %v28_v12 = vmul.f32 %v76_v5, %v8_v0  ;;  %v30_v13 = vmul.f32 %v75_v4, %v8_v0 }
   0x5   :  { %v21_v14 = vadd.f32 %v20_v7, %v19_v6  ;;  %v31_v15 = vmul.f32 %v74_v3, %v72_v1 }
   0x6   :  { %v26_v16 = vsub.f32 %v24_v9, %v25_v10  ;;  %v29_v17 = vsub.f32 %v27_v11, %v28_v12 }
   0x7   :  { %v23_v18 = vadd.f32 %v22_v8, %v21_v14  ;;  %v32_v19 = vsub.f32 %v30_v13, %v31_v15 }
   0x8   :  { %v33_v20 = vmul.f32 %v26_v16, %v26_v16  ;;  %v34_v21 = vmul.f32 %v29_v17, %v29_v17 }
   0x9   :  { %v36_v22 = vmul.f32 %v32_v19, %v32_v19  ;;  %v38_v24 = vmul.f32 %v23_v18, %v23_v18 }
   0xa   :  { %v35_v23 = vadd.f32 %v34_v21, %v33_v20 }
   0xc   :  { %v37_v25 = vadd.f32 %v36_v22, %v35_v23 }
   0xe   :  { %v39_v26 = vadd.f32 %v38_v24, %v37_v25 }
  0x10   :  { %78 = vrsqrt.f32 %v39_v26  ;;  %vm65_vm8 = vcmp.gt.f32.partialorder %v39_v26, 0.0 }
  0x1a   :  { %v79_v27 = vpop.eup %78 }
  0x1b   :  { %v41_v28 = vmul.f32 %v79_v27, %v23_v18 }
  0x1d   :  { %vm42_vm0 = vcmp.le.f32.partialorder %v41_v28, 0.9238795  ;;  %vm44_vm1 = vcmp.le.f32.partialorder %v41_v28, 0.70710677  ;;  %vm47_vm2 = vcmp.le.f32.partialorder %v41_v28, 0.38268343 }
  0x1e   :  { %v43_v30 = vsel %vm42_vm0, 1, %v80_v29  ;;  %v45_v31 = vsel %vm44_vm1, 1, %v80_v29  ;;  %v48_v32 = vsel %vm47_vm2, 1, %v80_v29  ;;  %vm50_vm3 = vcmp.le.f32.partialorder %v41_v28, 6.123234e-17 }
  0x1f   :  { %v46_v33 = vadd.s32 %v45_v31, %v43_v30  ;;  %vm53_vm4 = vcmp.le.f32.partialorder %v41_v28, -0.38268343  ;;  %v51_v34 = vsel %vm50_vm3, 1, %v80_v29  ;;  %vm56_vm5 = vcmp.le.f32.partialorder %v41_v28, -0.70710677 }
  0x20   :  { %v54_v36 = vsel %vm53_vm4, 1, %v80_v29  ;;  %vm59_vm6 = vcmp.le.f32.partialorder %v41_v28, -0.9238795  ;;  %v57_v38 = vsel %vm56_vm5, 1, %v80_v29  ;;  %vm62_vm7 = vcmp.le.f32.partialorder %v41_v28, -1.0 }
  0x21   :  { %v49_v35 = vadd.s32 %v48_v32, %v46_v33  ;;  %v60_v40 = vsel %vm59_vm6, 1, %v80_v29  ;;  %v63_v42 = vsel %vm62_vm7, 1, %v80_v29 }
  0x23   :  { %v52_v37 = vadd.s32 %v51_v34, %v49_v35 }
  0x25   :  { %v55_v39 = vadd.s32 %v54_v36, %v52_v37 }
  0x27   :  { %v58_v41 = vadd.s32 %v57_v38, %v55_v39 }
  0x29   :  { %v61_v43 = vadd.s32 %v60_v40, %v58_v41 }
  0x2b   :  { %v64_v44 = vadd.s32 %v63_v42, %v61_v43 }
  0x2d   :  { %v66_v45 = vsel %vm65_vm8, %v64_v44, 0 }
  0x2e   :  { %67 = vst [vmem:[%s113_s1] sm:$0xff] %v66_v45 }

</bundles_post_ra>
